<compile_context>
chip_gen: v6e
topology: v6e:2x2x1
jax: 0.10.0
libtpu: 0.0.40
codegen_flags: <defaults>
</compile_context>

<pallas_src>
import functools

import jax
import jax.numpy as jnp
from jax.experimental import pallas as pl
from jax.experimental.pallas import tpu as pltpu


def _layer_norm_kernel(*refs, eps: float, affine: bool, has_bias: bool):
    it = iter(refs)
    x_ref = next(it)
    w_ref = next(it) if affine else None
    b_ref = next(it) if has_bias else None
    o_ref = next(it)

    # One tile of rows: (TM, N). Reductions are over the last (lane) axis.
    x = x_ref[...].astype(jnp.float32)
    n_inv = 1.0 / x.shape[-1]
    mean = jnp.sum(x, axis=-1, keepdims=True) * n_inv
    mean_sq = jnp.sum(x * x, axis=-1, keepdims=True) * n_inv
    var = jnp.maximum(mean_sq - mean * mean, 0.0)
    rstd = jax.lax.rsqrt(var + eps)
    y = (x - mean) * rstd
    if affine:
        y = y * w_ref[...].astype(jnp.float32)
    if has_bias:
        y = y + b_ref[...].astype(jnp.float32)
    o_ref[...] = y.astype(o_ref.dtype)


def _choose_tile_m(M: int, N: int, itemsize: int,
                   target_bytes: int = 4 << 20, max_tile: int = 1024) -> int:
    """Rows per grid step: ~target_bytes of input, aligned to the sublane pack."""
    pack = max(8, 32 // max(itemsize, 1))      # 8 for f32, 16 for bf16/f16, 32 for int8
    tile = target_bytes // max(N * itemsize, 1)
    tile = int(min(tile, max_tile))
    tile = (tile // pack) * pack
    tile = max(tile, pack)
    if tile >= M:
        # Single block covering all rows; block dim == full array dim is legal
        # for any M (no 8-divisibility requirement in that case).
        return M
    return tile


def fused_layer_norm(x, weight=None, bias=None, eps=1e-6, *, tile_m=None):
    """Forward of xformers FusedLayerNorm. weight/bias are shape (N,) or None."""
    input_dtype = x.dtype
    # Matches the Triton fwd: bump eps for fp16 inputs.
    if input_dtype == jnp.float16:
        eps = max(eps, 1.6e-5)

    orig_shape = x.shape
    N = orig_shape[-1]
    x2 = x.reshape(-1, N)          # contiguous leading-dim merge: no data movement
    M = x2.shape[0]

    affine = weight is not None
    has_bias = bias is not None

    if tile_m is None:
        tile_m = _choose_tile_m(M, N, jnp.dtype(input_dtype).itemsize)
    grid = (pl.cdiv(M, tile_m),)

    in_specs = [pl.BlockSpec((tile_m, N), lambda i: (i, 0))]
    operands = [x2]
    if affine:
        in_specs.append(pl.BlockSpec((1, N), lambda i: (0, 0)))
        operands.append(weight.reshape(1, N))
    if has_bias:
        in_specs.append(pl.BlockSpec((1, N), lambda i: (0, 0)))
        operands.append(bias.reshape(1, N))

    kernel = functools.partial(_layer_norm_kernel, eps=float(eps),
                               affine=affine, has_bias=has_bias)

    out = pl.pallas_call(
        kernel,
        out_shape=jax.ShapeDtypeStruct((M, N), input_dtype),
        grid_spec=pltpu.PrefetchScalarGridSpec(
            num_scalar_prefetch=0,
            grid=grid,
            in_specs=in_specs,
            out_specs=pl.BlockSpec((tile_m, N), lambda i: (i, 0)),
        ),
        compiler_params=pltpu.CompilerParams(
            dimension_semantics=("parallel",),
            vmem_limit_bytes=48 * 1024 * 1024,
        ),
    )(*operands)

    return out.reshape(orig_shape)


class FusedLayerNorm:
    """Minimal JAX mirror of xformers.triton.layer_norm.FusedLayerNorm (fwd only)."""
    # TODO(synk): backward pass (layer_norm_bwd_* Triton kernels) not implemented.

    def __init__(self, normalized_shape, affine=True, bias=True, eps=1e-6):
        if affine:
            self.weight = jnp.ones((normalized_shape,), jnp.float32)
            self.bias = (jnp.zeros((normalized_shape,), jnp.float32)
                         if bias else None)
        else:
            self.weight = None
            self.bias = None
        self.epsilon = eps

    def __call__(self, x):
        return fused_layer_norm(x, self.weight, self.bias, self.epsilon)


def _ref_layer_norm(x, w, b, eps):
    xf = x.astype(jnp.float32)
    mean = jnp.mean(xf, axis=-1, keepdims=True)
    var = jnp.mean((xf - mean) ** 2, axis=-1, keepdims=True)
    out = (xf - mean) * jax.lax.rsqrt(var + eps)
    if w is not None:
        out = out * w
    if b is not None:
        out = out + b
    return out.astype(x.dtype)


if __name__ == "__main__":
    key = jax.random.PRNGKey(0)
    kx, kw, kb, kx2 = jax.random.split(key, 4)

    batch, seq, hidden = 2, 8, 32
    x = jax.random.normal(kx, (batch, seq, hidden), dtype=jnp.float32)

    # Module __init__ uses ones/zeros; perturb deterministically so the affine
    # path is actually exercised.
    ln = FusedLayerNorm(hidden, affine=True, bias=True, eps=1e-6)
    ln.weight = ln.weight + 0.1 * jax.random.normal(kw, (hidden,), jnp.float32)
    ln.bias = ln.bias + 0.1 * jax.random.normal(kb, (hidden,), jnp.float32)

    y = jax.block_until_ready(ln(x))
    y_ref = _ref_layer_norm(x, ln.weight, ln.bias, 1e-6)
    assert y.shape == x.shape and y.dtype == x.dtype
    assert jnp.allclose(y, y_ref, atol=1e-5, rtol=1e-5), "mismatch vs reference"

    # Ragged last block + no-affine path: M=20 with tile_m=8 -> grid=3 with a
    # partial (OOB) last block; also exercises the weight/bias-absent operands.
    x_r = jax.random.normal(kx2, (20, hidden), dtype=jnp.float32)
    y_r = jax.block_until_ready(fused_layer_norm(x_r, None, None, 1e-6, tile_m=8))
    y_r_ref = _ref_layer_norm(x_r, None, None, 1e-6)
    assert jnp.allclose(y_r, y_r_ref, atol=1e-5, rtol=1e-5), "ragged-block mismatch"

    print("KERNEL_OK")
</pallas_src>

<mosaic_0001>
module attributes {stable_mosaic.version = 11 : i64} {
  func.func @_layer_norm_kernel(%arg0: i32, %arg1: memref<16x32xf32, #tpu.memory_space<vmem>>, %arg2: memref<1x32xf32, #tpu.memory_space<vmem>>, %arg3: memref<1x32xf32, #tpu.memory_space<vmem>>, %arg4: memref<16x32xf32, #tpu.memory_space<vmem>>) attributes {dimension_semantics = [#tpu.dimension_semantics<parallel>], iteration_bounds = array<i64: 1>, scalar_prefetch = 0 : i64, scratch_operands = 0 : i64, tpu.core_type = #tpu.core_type<tc>, window_params = [{transform_indices = @transform_0, window_bounds = array<i64: 16, 32>}, {pipeline_mode = #tpu.pipeline_mode<synchronous>, transform_indices = @transform_1, window_bounds = array<i64: 1, 32>}, {pipeline_mode = #tpu.pipeline_mode<synchronous>, transform_indices = @transform_2, window_bounds = array<i64: 1, 32>}, {transform_indices = @transform_3, window_bounds = array<i64: 16, 32>}]} {
    %c0 = arith.constant 0 : index
    %c0_0 = arith.constant 0 : index
    %0 = vector.load %arg1[%c0, %c0_0] : memref<16x32xf32, #tpu.memory_space<vmem>>, vector<16x32xf32>
    %cst = arith.constant dense<0.000000e+00> : vector<16xf32>
    %1 = vector.multi_reduction <add>, %0, %cst [1] : vector<16x32xf32> to vector<16xf32>
    %2 = vector.shape_cast %1 : vector<16xf32> to vector<16x1xf32>
    %cst_1 = arith.constant 3.125000e-02 : f32
    %3 = vector.broadcast %cst_1 : f32 to vector<16x1xf32>
    %4 = arith.mulf %2, %3 : vector<16x1xf32>
    %5 = arith.mulf %0, %0 : vector<16x32xf32>
    %cst_2 = arith.constant dense<0.000000e+00> : vector<16xf32>
    %6 = vector.multi_reduction <add>, %5, %cst_2 [1] : vector<16x32xf32> to vector<16xf32>
    %7 = vector.shape_cast %6 : vector<16xf32> to vector<16x1xf32>
    %cst_3 = arith.constant 3.125000e-02 : f32
    %8 = vector.broadcast %cst_3 : f32 to vector<16x1xf32>
    %9 = arith.mulf %7, %8 : vector<16x1xf32>
    %10 = arith.mulf %4, %4 : vector<16x1xf32>
    %11 = arith.subf %9, %10 : vector<16x1xf32>
    %cst_4 = arith.constant 0.000000e+00 : f32
    %12 = vector.broadcast %cst_4 : f32 to vector<16x1xf32>
    %13 = arith.maximumf %11, %12 : vector<16x1xf32>
    %cst_5 = arith.constant 9.99999997E-7 : f32
    %14 = vector.broadcast %cst_5 : f32 to vector<16x1xf32>
    %15 = arith.addf %13, %14 : vector<16x1xf32>
    %16 = math.rsqrt %15 : vector<16x1xf32>
    %17 = vector.broadcast %4 : vector<16x1xf32> to vector<16x32xf32>
    %18 = arith.subf %0, %17 : vector<16x32xf32>
    %19 = vector.broadcast %16 : vector<16x1xf32> to vector<16x32xf32>
    %20 = arith.mulf %18, %19 : vector<16x32xf32>
    %c0_6 = arith.constant 0 : index
    %c0_7 = arith.constant 0 : index
    %21 = vector.load %arg2[%c0_6, %c0_7] : memref<1x32xf32, #tpu.memory_space<vmem>>, vector<1x32xf32>
    %22 = vector.broadcast %21 : vector<1x32xf32> to vector<16x32xf32>
    %23 = arith.mulf %20, %22 : vector<16x32xf32>
    %c0_8 = arith.constant 0 : index
    %c0_9 = arith.constant 0 : index
    %24 = vector.load %arg3[%c0_8, %c0_9] : memref<1x32xf32, #tpu.memory_space<vmem>>, vector<1x32xf32>
    %25 = vector.broadcast %24 : vector<1x32xf32> to vector<16x32xf32>
    %26 = arith.addf %23, %25 : vector<16x32xf32>
    %c0_10 = arith.constant 0 : index
    %c0_11 = arith.constant 0 : index
    %27 = vector.load %arg4[%c0_10, %c0_11] : memref<16x32xf32, #tpu.memory_space<vmem>>, vector<16x32xf32>
    tpu.vector_store %arg4[%c0_10, %c0_11], %26 {strides = array<i32>} : memref<16x32xf32, #tpu.memory_space<vmem>>, vector<16x32xf32>,
    return
  }
  func.func @transform_0(%arg0: i32) -> (i32, i32) {
    %c0_i32 = arith.constant 0 : i32
    %c0_i32_0 = arith.constant 0 : i32
    return %arg0, %c0_i32 : i32, i32
  }
  func.func @transform_1(%arg0: i32) -> (i32, i32) {
    %c0_i32 = arith.constant 0 : i32
    %c0_i32_0 = arith.constant 0 : i32
    %c0_i32_1 = arith.constant 0 : i32
    return %c0_i32, %c0_i32_0 : i32, i32
  }
  func.func @transform_2(%arg0: i32) -> (i32, i32) {
    %c0_i32 = arith.constant 0 : i32
    %c0_i32_0 = arith.constant 0 : i32
    %c0_i32_1 = arith.constant 0 : i32
    return %c0_i32, %c0_i32_0 : i32, i32
  }
  func.func @transform_3(%arg0: i32) -> (i32, i32) {
    %c0_i32 = arith.constant 0 : i32
    %c0_i32_0 = arith.constant 0 : i32
    return %arg0, %c0_i32 : i32, i32
  }
}

</mosaic_0001>

<bundles_post_ra>
// kernel: tpu_custom_call.1
= control target key start
LH: loop header
LB: loop body
LE: loop exit
PB: predicated region body
PF: predicated region fallthrough
CT: control target
= control target key end

     0   :  { %8 = vsyncpa [#allocation3], 0  ;;  %s203_s0 = inlined_call_operand.hbm [shape: f32[16,32], index: 0, kind: input, shape index: {}]   ;;  %s204_s1 = inlined_call_operand.vmem [shape: f32[1,32], index: 1, kind: input, shape index: {}]   ;;  %s205_s2 = inlined_call_operand.vmem [shape: f32[1,32], index: 2, kind: input, shape index: {}]   ;;  %s206_s3 = inlined_call_operand.hbm [shape: f32[16,32], index: 3, kind: output, shape index: {}]  }
   0x1   :  { %9 = vsyncpa [#allocation4], 0  ;;  %s155_s12 = smov [#allocation2]  }
   0x2   :  { %s15_s13 = sshll.u32 %s155_s12, 4  ;;  %s16_s13 = int_to_ptr.vmem [resolvable:$true] %s15_s13 }
   0x3   :  { %s119_s14 = scalar_lea.vmem %s16_s13, 256  ;;  %p124_p1 = scmp.lt.s32.totalorder %s16_s13, %s16_s13 }
   0x4   :  { %p120_p0 = scmp.ne.s32.totalorder %s16_s13, %s119_s14  ;;  %p125_p2 = scmp.lt.s32.totalorder %s119_s14, %s119_s14 }
   0x6   :  { %p126_p3 = por %p125_p2, %p124_p1 }
   0x8   :  { %p127_p4 = pnand %p126_p3, %p120_p0 }
   0xa   :  { %130 = shalt.err (!%p127_p4)
}
   0xb   :  { %s156_s15 = smov 128   ;;  %s157_s16 = smov 8  }
   0xc   :  { %21 = dma.hbm_to_vmem [thread:$0]  %s203_s0, 256, %s16_s13, [#allocation3], %s156_s15, %s156_s15, %s157_s16  }
   0xd   :  { %151 = dma.done.wait [#allocation3], 256  }
   0xe   :  { %152 = vsyncadd [#allocation3], 4294967040  ;;  %vm31_vm0 = vcmask 261120   ;;  %v29_v0 = vld [vmem:[#allocation2] sm:$0xff]  ;;  %v30_v1 = vld [vmem:[#allocation2 + $0x8] sm:$0xff]  ;;  %s158_s22 = smov [#allocation5]  }
   0xf   :  { %v32_v2 = vsel %vm31_vm0, %v29_v0, 0.0  ;;  %v40_v3 = vmul.f32 %v29_v0, %v29_v0  ;;  %v41_v4 = vmul.f32 %v30_v1, %v30_v1  ;;  %v35_v6 = vsel %vm31_vm0, %v30_v1, 0.0  ;;  %v101_v26 = vld [vmem:[%s204_s1] ss:$0 sm:$0xff]  ;;  %s89_s23 = sshll.u32 %s158_s22, 4  ;;  %s90_s23 = int_to_ptr.vmem [resolvable:$true] %s89_s23 }
  0x10   :  { %33 = vadd.xlane.f32.xlu0 %v32_v2  ;;  %v102_v28 = vld [vmem:[%s205_s2] ss:$0 sm:$0xff]  ;;  %s131_s1 = scalar_lea.vmem %s90_s23, 256  ;;  %p136_p6 = scmp.lt.s32.totalorder %s90_s23, %s90_s23 }
  0x11   :  { %v42_v5 = vsel %vm31_vm0, %v40_v3, 0.0  ;;  %v45_v7 = vsel %vm31_vm0, %v41_v4, 0.0  ;;  %p132_p5 = scmp.ne.s32.totalorder %s90_s23, %s131_s1  ;;  %p137_p7 = scmp.lt.s32.totalorder %s131_s1, %s131_s1 }
  0x12   :  { %43 = vadd.xlane.f32.xlu1 %v42_v5 }
  0x13   :  { %p138_p8 = por %p137_p7, %p136_p6 }
  0x14   :  { %36 = vadd.xlane.f32.xlu0 %v35_v6 }
  0x15   :  { %p139_p9 = pnand %p138_p8, %p132_p5 }
  0x16   :  { %46 = vadd.xlane.f32.xlu1 %v45_v7 }
  0x99   :  { %v34_v8 = vpop.xlane.xlu0 %33 }
  0x9a   :  { %v38_v9 = vmul.f32 0.03125, %v34_v8 }
  0x9b   :  { %v44_v10 = vpop.xlane.xlu1 %43 }
  0x9c   :  { %v50_v11 = vmul.f32 %v38_v9, %v38_v9  ;;  %v48_v12 = vmul.f32 0.03125, %v44_v10  ;;  %v60_v24 = vsub.f32 %v29_v0, %v38_v9 }
  0x9d   :  { %v37_v13 = vpop.xlane.xlu0 %36 }
  0x9e   :  { %v52_v14 = vsub.f32 %v48_v12, %v50_v11  ;;  %v39_v15 = vmul.f32 0.03125, %v37_v13 }
  0x9f   :  { %v47_v16 = vpop.xlane.xlu1 %46 }
  0xa0   :  { %v54_v17 = vmax.f32 %v52_v14, 0.0  ;;  %v51_v18 = vmul.f32 %v39_v15, %v39_v15  ;;  %v49_v19 = vmul.f32 0.03125, %v47_v16  ;;  %v61_v29 = vsub.f32 %v30_v1, %v39_v15 }
  0xa2   :  { %v56_v20 = vadd.f32 1e-06, %v54_v17  ;;  %v53_v21 = vsub.f32 %v49_v19, %v51_v18 }
  0xa4   :  { %107 = vrsqrt.f32 %v56_v20  ;;  %v55_v22 = vmax.f32 %v53_v21, 0.0 }
  0xa6   :  { %v57_v23 = vadd.f32 1e-06, %v55_v22 }
  0xa8   :  { %109 = vrsqrt.f32 %v57_v23 }
  0xb1   :  { %v108_v25 = vpop.eup %107 }
  0xb2   :  { %v62_v27 = vmul.f32 %v108_v25, %v60_v24 }
  0xb4   :  { %v71_v30 = vmul.f32 %v101_v26, %v62_v27 }
  0xb5   :  { %v110_v31 = vpop.eup %109 }
  0xb6   :  { %v63_v32 = vmul.f32 %v110_v31, %v61_v29  ;;  %v80_v33 = vadd.f32 %v102_v28, %v71_v30 }
  0xb8   :  { %v72_v34 = vmul.f32 %v101_v26, %v63_v32  ;;  %82 = vst.msk [vmem:[#allocation5] sm:$0xff] %vm31_vm0, %v80_v33 }
  0xba   :  { %v81_v35 = vadd.f32 %v102_v28, %v72_v34 }
  0xbc   :  { %83 = vst.msk [vmem:[#allocation5 + $0x8] sm:$0xff] %vm31_vm0, %v81_v35 }
  0xbd   :  { %142 = shalt.err (!%p139_p9)
}
  0xbe   :  { %95 = dma.vmem_to_hbm [thread:$0]  %s90_s23, 256, %s206_s3, [#allocation4], %s156_s15, %s156_s15, %s157_s16  }
  0xbf   :  { %153 = dma.done.wait [#allocation4], 256  }
  0xc0   :  { %154 = vsyncadd [#allocation4], 4294967040 }
  0xc1   :  { %99 = vsyncpa [#allocation3], 1 }
  0xc2   :  { %100 = vsyncpa [#allocation4], 1 }

</bundles_post_ra>
